<compile_context>
chip_gen: v5e
topology: v5e:2x2
jax: 0.10.0
libtpu: 0.0.40
codegen_flags: <defaults>
</compile_context>

<pallas_src>
import functools

import jax
import jax.numpy as jnp
from jax import lax
from jax.experimental import pallas as pl
from jax.experimental.pallas import tpu as pltpu


def _block_g_diff_kernel(x_ref, xl_ref, xr_ref, w_ref, p_ref, out_ref, *, eps):
    # x_ref:   (1, C_in, TN)     input tile, native dtype
    # xl_ref:  (1, 1, C_in, 1)   column x[:, tile_start - 1] (zero at seq edge)
    # xr_ref:  (1, 1, C_in, 1)   column x[:, tile_end]       (zero at seq edge)
    # w_ref:   (3, C_out, C_in)  conv weight, tap-major, native dtype
    # p_ref:   (3, C_out, 1)     [bias; gamma; beta], f32
    # out_ref: (1, C_out, TN)
    x = x_ref[0]                                           # (C_in, TN)
    tn = x.shape[-1]
    lane = lax.broadcasted_iota(jnp.int32, x.shape, 1)

    # Shift-by-one along lanes on the XLU; fix the wrapped boundary column with
    # the halo column (previous/next tile, or zero at the sequence edge).
    x_left = jnp.where(lane == 0, xl_ref[0, 0], pltpu.roll(x, shift=1, axis=1))
    x_right = jnp.where(lane == tn - 1, xr_ref[0, 0],
                        pltpu.roll(x, shift=tn - 1, axis=1))  # == roll by -1

    # Conv1d(kernel_size=3, padding=1): three aligned MXU matmuls, f32 acc.
    # (For C_in <= 128 these could be folded into one K=3*C_in matmul.)
    y = jnp.dot(w_ref[1], x, preferred_element_type=jnp.float32)
    y = y + jnp.dot(w_ref[0], x_left, preferred_element_type=jnp.float32)
    y = y + jnp.dot(w_ref[2], x_right, preferred_element_type=jnp.float32)
    y = y + p_ref[0]                                       # conv bias (C_out, 1)

    # LayerNorm over channels (sublane axis), single-pass statistics.
    inv_c = 1.0 / y.shape[0]
    mean = jnp.sum(y, axis=0, keepdims=True) * inv_c       # (1, TN)
    var = jnp.sum(y * y, axis=0, keepdims=True) * inv_c - mean * mean
    z = (y - mean) * lax.rsqrt(var + eps)
    z = z * p_ref[1] + p_ref[2]                            # gamma, beta

    # SiLU, stored straight into the lane-dense output block.
    out_ref[0] = (z * jax.nn.sigmoid(z)).astype(out_ref.dtype)


def _choose_tile_n(n, c_in, c_out, in_item, out_item,
                   budget_bytes=24 << 20, max_tile=2048):
    """Largest lane-aligned divisor of n whose per-step footprint fits budget."""
    if n % 128 != 0:
        return n  # small / unaligned sequence: single full-N block

    def footprint(tn):
        io = 2 * tn * (c_in * in_item + c_out * out_item)      # double-buffered I/O
        tmp = tn * (2 * c_in * in_item + 3 * c_out * 4)        # x_left/x_right, y, z, silu
        return io + tmp

    cands = [t for t in range(128, min(n, max_tile) + 1, 128) if n % t == 0]
    if not cands:
        return n
    fitting = [t for t in cands if footprint(t) <= budget_bytes]
    return max(fitting) if fitting else min(cands)


def block_g_diff(x, w, b, gamma, beta, *, eps=1e-5, max_tile_n=2048):
    """Pallas equivalent of BlockGDiff(dim, dim_out).forward(x).

    x:     (B, C_in, N)
    w:     (C_out, C_in, 3)  Conv1d weight
    b:     (C_out,)          Conv1d bias
    gamma: (C_out,)          LayerNorm weight
    beta:  (C_out,)          LayerNorm bias
    Returns (B, C_out, N), same dtype as x.
    """
    B, c_in, n = x.shape
    c_out = w.shape[0]

    tn = _choose_tile_n(n, c_in, c_out, x.dtype.itemsize, x.dtype.itemsize,
                        max_tile=max_tile_n)
    nt = n // tn if n % tn == 0 else 1
    if nt == 1:
        tn = n

    # Tiny per-tile halo columns (NT columns per batch, not a padded copy of x).
    # x_left[:, :, j]  = x[:, :, j*tn - 1]   (zero for j == 0)
    # x_right[:, :, j] = x[:, :, (j+1)*tn]   (zero for j == nt-1)
    left_cols = x[:, :, tn - 1:n - 1:tn]                       # (B, C_in, nt-1)
    right_cols = x[:, :, tn:n:tn]                              # (B, C_in, nt-1)
    x_left = jnp.pad(left_cols, ((0, 0), (0, 0), (1, 0)))
    x_right = jnp.pad(right_cols, ((0, 0), (0, 0), (0, 1)))
    x_left = jnp.transpose(x_left, (0, 2, 1))[:, :, :, None]   # (B, nt, C_in, 1)
    x_right = jnp.transpose(x_right, (0, 2, 1))[:, :, :, None]

    # Parameters: tap-major weight in the matmul dtype; bias/gamma/beta merged
    # into one f32 block (stays VMEM-resident via constant index maps).
    w_taps = jnp.transpose(w, (2, 0, 1)).astype(x.dtype)        # (3, C_out, C_in)
    params = jnp.stack([b, gamma, beta]).astype(jnp.float32)[:, :, None]

    kernel = functools.partial(_block_g_diff_kernel, eps=eps)

    return pl.pallas_call(
        kernel,
        out_shape=jax.ShapeDtypeStruct((B, c_out, n), x.dtype),
        grid=(B, nt),
        in_specs=[
            pl.BlockSpec((1, c_in, tn), lambda bi, ni: (bi, 0, ni)),
            pl.BlockSpec((1, 1, c_in, 1), lambda bi, ni: (bi, ni, 0, 0)),
            pl.BlockSpec((1, 1, c_in, 1), lambda bi, ni: (bi, ni, 0, 0)),
            pl.BlockSpec((3, c_out, c_in), lambda bi, ni: (0, 0, 0)),
            pl.BlockSpec((3, c_out, 1), lambda bi, ni: (0, 0, 0)),
        ],
        out_specs=pl.BlockSpec((1, c_out, tn), lambda bi, ni: (bi, 0, ni)),
        compiler_params=pltpu.CompilerParams(
            dimension_semantics=("parallel", "parallel"),
            vmem_limit_bytes=56 * 1024 * 1024),
    )(x, x_left, x_right, w_taps, params)


def _reference(x, w, b, gamma, beta, eps=1e-5):
    # Exact f32 element-wise reference (no MXU): conv via explicit taps.
    B, c_in, n = x.shape
    c_out = w.shape[0]
    xp = jnp.pad(x.astype(jnp.float32), ((0, 0), (0, 0), (1, 1)))
    y = jnp.zeros((B, c_out, n), jnp.float32)
    for k in range(3):
        wk = w[:, :, k].astype(jnp.float32)                     # (C_out, C_in)
        y = y + jnp.sum(xp[:, None, :, k:k + n] * wk[None, :, :, None], axis=2)
    y = y + b[None, :, None]
    mean = jnp.mean(y, axis=1, keepdims=True)
    var = jnp.mean((y - mean) ** 2, axis=1, keepdims=True)
    y = (y - mean) / jnp.sqrt(var + eps)
    y = y * gamma[None, :, None] + beta[None, :, None]
    return y * jax.nn.sigmoid(y)


if __name__ == "__main__":
    key = jax.random.PRNGKey(0)
    kx, kw, kb, kg, kbe = jax.random.split(key, 5)

    B, DIM, DIM_OUT, N = 2, 8, 16, 256
    x = jax.random.normal(kx, (B, DIM, N), dtype=jnp.float32)
    w = 0.3 * jax.random.normal(kw, (DIM_OUT, DIM, 3), dtype=jnp.float32)
    b = 0.1 * jax.random.normal(kb, (DIM_OUT,), dtype=jnp.float32)
    gamma = 1.0 + 0.1 * jax.random.normal(kg, (DIM_OUT,), dtype=jnp.float32)
    beta = 0.1 * jax.random.normal(kbe, (DIM_OUT,), dtype=jnp.float32)

    # max_tile_n=128 -> grid (B=2, NT=2): exercises the cross-tile halo path and
    # exposes multiple parallel steps per axis.
    out = block_g_diff(x, w, b, gamma, beta, max_tile_n=128)
    out = jax.block_until_ready(out)

    ref = _reference(x, w, b, gamma, beta)
    assert out.shape == (B, DIM_OUT, N)
    assert jnp.allclose(out, ref, atol=5e-3, rtol=5e-3), "mismatch vs reference"
    print("KERNEL_OK")
</pallas_src>

<mosaic_0001>
module attributes {stable_mosaic.version = 11 : i64} {
  func.func @_block_g_diff_kernel(%arg0: i32, %arg1: i32, %arg2: memref<1x8x128xf32, #tpu.memory_space<vmem>>, %arg3: memref<1x1x8x1xf32, #tpu.memory_space<vmem>>, %arg4: memref<1x1x8x1xf32, #tpu.memory_space<vmem>>, %arg5: memref<3x16x8xf32, #tpu.memory_space<vmem>>, %arg6: memref<3x16x1xf32, #tpu.memory_space<vmem>>, %arg7: memref<1x16x128xf32, #tpu.memory_space<vmem>>) attributes {dimension_semantics = [#tpu.dimension_semantics<parallel>, #tpu.dimension_semantics<parallel>], iteration_bounds = array<i64: 2, 2>, scalar_prefetch = 0 : i64, scratch_operands = 0 : i64, tpu.core_type = #tpu.core_type<tc>, window_params = [{transform_indices = @transform_0, window_bounds = array<i64: 1, 8, 128>}, {transform_indices = @transform_1, window_bounds = array<i64: 1, 1, 8, 1>}, {transform_indices = @transform_2, window_bounds = array<i64: 1, 1, 8, 1>}, {pipeline_mode = #tpu.pipeline_mode<synchronous>, transform_indices = @transform_3, window_bounds = array<i64: 3, 16, 8>}, {pipeline_mode = #tpu.pipeline_mode<synchronous>, transform_indices = @transform_4, window_bounds = array<i64: 3, 16, 1>}, {transform_indices = @transform_5, window_bounds = array<i64: 1, 16, 128>}]} {
    %c0 = arith.constant 0 : index
    %c0_0 = arith.constant 0 : index
    %c0_1 = arith.constant 0 : index
    %0 = vector.load %arg2[%c0, %c0_0, %c0_1] : memref<1x8x128xf32, #tpu.memory_space<vmem>>, vector<1x8x128xf32>
    %1 = vector.shape_cast %0 : vector<1x8x128xf32> to vector<8x128xf32>
    %2 = tpu.iota {dimensions = array<i32: 1>} : vector<8x128xi32>
    %c0_i32 = arith.constant 0 : i32
    %3 = vector.broadcast %c0_i32 : i32 to vector<8x128xi32>
    %4 = arith.cmpi eq, %2, %3 : vector<8x128xi32>
    %c0_2 = arith.constant 0 : index
    %c0_3 = arith.constant 0 : index
    %c0_4 = arith.constant 0 : index
    %c0_5 = arith.constant 0 : index
    %5 = vector.load %arg3[%c0_2, %c0_3, %c0_4, %c0_5] : memref<1x1x8x1xf32, #tpu.memory_space<vmem>>, vector<1x1x8x1xf32>
    %6 = vector.shape_cast %5 : vector<1x1x8x1xf32> to vector<8x1xf32>
    %c1_i32 = arith.constant 1 : i32
    %7 = tpu.dynamic_rotate %1 by %c1_i32 dim 1 : vector<8x128xf32>, i32 -> vector<8x128xf32>
    %8 = vector.shape_cast %6 : vector<8x1xf32> to vector<8x1xf32>
    %9 = vector.broadcast %8 : vector<8x1xf32> to vector<8x128xf32>
    %10 = arith.select %4, %9, %7 : vector<8x128xi1>, vector<8x128xf32>
    %c127_i32 = arith.constant 127 : i32
    %11 = vector.broadcast %c127_i32 : i32 to vector<8x128xi32>
    %12 = arith.cmpi eq, %2, %11 : vector<8x128xi32>
    %c0_6 = arith.constant 0 : index
    %c0_7 = arith.constant 0 : index
    %c0_8 = arith.constant 0 : index
    %c0_9 = arith.constant 0 : index
    %13 = vector.load %arg4[%c0_6, %c0_7, %c0_8, %c0_9] : memref<1x1x8x1xf32, #tpu.memory_space<vmem>>, vector<1x1x8x1xf32>
    %14 = vector.shape_cast %13 : vector<1x1x8x1xf32> to vector<8x1xf32>
    %c127_i32_10 = arith.constant 127 : i32
    %15 = tpu.dynamic_rotate %1 by %c127_i32_10 dim 1 : vector<8x128xf32>, i32 -> vector<8x128xf32>
    %16 = vector.shape_cast %14 : vector<8x1xf32> to vector<8x1xf32>
    %17 = vector.broadcast %16 : vector<8x1xf32> to vector<8x128xf32>
    %18 = arith.select %12, %17, %15 : vector<8x128xi1>, vector<8x128xf32>
    %c1 = arith.constant 1 : index
    %c0_11 = arith.constant 0 : index
    %c0_12 = arith.constant 0 : index
    %19 = vector.load %arg5[%c1, %c0_11, %c0_12] : memref<3x16x8xf32, #tpu.memory_space<vmem>>, vector<1x16x8xf32>
    %20 = vector.shape_cast %19 : vector<1x16x8xf32> to vector<16x8xf32>
    %cst = arith.constant dense<0.000000e+00> : vector<16x128xf32>
    %21 = tpu.matmul %20, %1, %cst {dimension_numbers = #tpu.dot_dimension_numbers<[1], [0], [0], [1], [0, 0, 1, 1], [], []>} : vector<16x8xf32>, vector<8x128xf32>, vector<16x128xf32> -> vector<16x128xf32>
    %c0_13 = arith.constant 0 : index
    %c0_14 = arith.constant 0 : index
    %c0_15 = arith.constant 0 : index
    %22 = vector.load %arg5[%c0_13, %c0_14, %c0_15] : memref<3x16x8xf32, #tpu.memory_space<vmem>>, vector<1x16x8xf32>
    %23 = vector.shape_cast %22 : vector<1x16x8xf32> to vector<16x8xf32>
    %cst_16 = arith.constant dense<0.000000e+00> : vector<16x128xf32>
    %24 = tpu.matmul %23, %10, %cst_16 {dimension_numbers = #tpu.dot_dimension_numbers<[1], [0], [0], [1], [0, 0, 1, 1], [], []>} : vector<16x8xf32>, vector<8x128xf32>, vector<16x128xf32> -> vector<16x128xf32>
    %25 = arith.addf %21, %24 : vector<16x128xf32>
    %c2 = arith.constant 2 : index
    %c0_17 = arith.constant 0 : index
    %c0_18 = arith.constant 0 : index
    %26 = vector.load %arg5[%c2, %c0_17, %c0_18] : memref<3x16x8xf32, #tpu.memory_space<vmem>>, vector<1x16x8xf32>
    %27 = vector.shape_cast %26 : vector<1x16x8xf32> to vector<16x8xf32>
    %cst_19 = arith.constant dense<0.000000e+00> : vector<16x128xf32>
    %28 = tpu.matmul %27, %18, %cst_19 {dimension_numbers = #tpu.dot_dimension_numbers<[1], [0], [0], [1], [0, 0, 1, 1], [], []>} : vector<16x8xf32>, vector<8x128xf32>, vector<16x128xf32> -> vector<16x128xf32>
    %29 = arith.addf %25, %28 : vector<16x128xf32>
    %c0_20 = arith.constant 0 : index
    %c0_21 = arith.constant 0 : index
    %c0_22 = arith.constant 0 : index
    %30 = vector.load %arg6[%c0_20, %c0_21, %c0_22] : memref<3x16x1xf32, #tpu.memory_space<vmem>>, vector<1x16x1xf32>
    %31 = vector.shape_cast %30 : vector<1x16x1xf32> to vector<16x1xf32>
    %32 = vector.broadcast %31 : vector<16x1xf32> to vector<16x128xf32>
    %33 = arith.addf %29, %32 : vector<16x128xf32>
    %cst_23 = arith.constant dense<0.000000e+00> : vector<128xf32>
    %34 = vector.multi_reduction <add>, %33, %cst_23 [0] : vector<16x128xf32> to vector<128xf32>
    %35 = vector.shape_cast %34 : vector<128xf32> to vector<1x128xf32>
    %cst_24 = arith.constant 6.250000e-02 : f32
    %36 = vector.broadcast %cst_24 : f32 to vector<1x128xf32>
    %37 = arith.mulf %35, %36 : vector<1x128xf32>
    %38 = arith.mulf %33, %33 : vector<16x128xf32>
    %cst_25 = arith.constant dense<0.000000e+00> : vector<128xf32>
    %39 = vector.multi_reduction <add>, %38, %cst_25 [0] : vector<16x128xf32> to vector<128xf32>
    %40 = vector.shape_cast %39 : vector<128xf32> to vector<1x128xf32>
    %cst_26 = arith.constant 6.250000e-02 : f32
    %41 = vector.broadcast %cst_26 : f32 to vector<1x128xf32>
    %42 = arith.mulf %40, %41 : vector<1x128xf32>
    %43 = arith.mulf %37, %37 : vector<1x128xf32>
    %44 = arith.subf %42, %43 : vector<1x128xf32>
    %45 = vector.broadcast %37 : vector<1x128xf32> to vector<16x128xf32>
    %46 = arith.subf %33, %45 : vector<16x128xf32>
    %cst_27 = arith.constant 9.99999974E-6 : f32
    %47 = vector.broadcast %cst_27 : f32 to vector<1x128xf32>
    %48 = arith.addf %44, %47 : vector<1x128xf32>
    %49 = math.rsqrt %48 : vector<1x128xf32>
    %50 = vector.broadcast %49 : vector<1x128xf32> to vector<16x128xf32>
    %51 = arith.mulf %46, %50 : vector<16x128xf32>
    %c1_28 = arith.constant 1 : index
    %c0_29 = arith.constant 0 : index
    %c0_30 = arith.constant 0 : index
    %52 = vector.load %arg6[%c1_28, %c0_29, %c0_30] : memref<3x16x1xf32, #tpu.memory_space<vmem>>, vector<1x16x1xf32>
    %53 = vector.shape_cast %52 : vector<1x16x1xf32> to vector<16x1xf32>
    %54 = vector.broadcast %53 : vector<16x1xf32> to vector<16x128xf32>
    %55 = arith.mulf %51, %54 : vector<16x128xf32>
    %c2_31 = arith.constant 2 : index
    %c0_32 = arith.constant 0 : index
    %c0_33 = arith.constant 0 : index
    %56 = vector.load %arg6[%c2_31, %c0_32, %c0_33] : memref<3x16x1xf32, #tpu.memory_space<vmem>>, vector<1x16x1xf32>
    %57 = vector.shape_cast %56 : vector<1x16x1xf32> to vector<16x1xf32>
    %58 = vector.broadcast %57 : vector<16x1xf32> to vector<16x128xf32>
    %59 = arith.addf %55, %58 : vector<16x128xf32>
    %60 = arith.negf %59 : vector<16x128xf32>
    %61 = math.exp %60 : vector<16x128xf32>
    %cst_34 = arith.constant 1.000000e+00 : f32
    %62 = vector.broadcast %cst_34 : f32 to vector<16x128xf32>
    %63 = arith.addf %62, %61 : vector<16x128xf32>
    %64 = arith.divf %62, %63 : vector<16x128xf32>
    %65 = arith.mulf %59, %64 : vector<16x128xf32>
    %c0_35 = arith.constant 0 : index
    %c0_36 = arith.constant 0 : index
    %c0_37 = arith.constant 0 : index
    %66 = vector.load %arg7[%c0_35, %c0_36, %c0_37] : memref<1x16x128xf32, #tpu.memory_space<vmem>>, vector<1x16x128xf32>
    %67 = vector.shape_cast %66 : vector<1x16x128xf32> to vector<16x128xf32>
    %68 = vector.shape_cast %65 : vector<16x128xf32> to vector<1x16x128xf32>
    tpu.vector_store %arg7[%c0_35, %c0_36, %c0_37], %68 {strides = array<i32>} : memref<1x16x128xf32, #tpu.memory_space<vmem>>, vector<1x16x128xf32>,
    return
  }
  func.func @transform_0(%arg0: i32, %arg1: i32) -> (i32, i32, i32) {
    %c0_i32 = arith.constant 0 : i32
    %c0_i32_0 = arith.constant 0 : i32
    return %arg0, %c0_i32, %arg1 : i32, i32, i32
  }
  func.func @transform_1(%arg0: i32, %arg1: i32) -> (i32, i32, i32, i32) {
    %c0_i32 = arith.constant 0 : i32
    %c0_i32_0 = arith.constant 0 : i32
    %c0_i32_1 = arith.constant 0 : i32
    return %arg0, %arg1, %c0_i32, %c0_i32_0 : i32, i32, i32, i32
  }
  func.func @transform_2(%arg0: i32, %arg1: i32) -> (i32, i32, i32, i32) {
    %c0_i32 = arith.constant 0 : i32
    %c0_i32_0 = arith.constant 0 : i32
    %c0_i32_1 = arith.constant 0 : i32
    return %arg0, %arg1, %c0_i32, %c0_i32_0 : i32, i32, i32, i32
  }
  func.func @transform_3(%arg0: i32, %arg1: i32) -> (i32, i32, i32) {
    %c0_i32 = arith.constant 0 : i32
    %c0_i32_0 = arith.constant 0 : i32
    %c0_i32_1 = arith.constant 0 : i32
    %c0_i32_2 = arith.constant 0 : i32
    return %c0_i32, %c0_i32_0, %c0_i32_1 : i32, i32, i32
  }
  func.func @transform_4(%arg0: i32, %arg1: i32) -> (i32, i32, i32) {
    %c0_i32 = arith.constant 0 : i32
    %c0_i32_0 = arith.constant 0 : i32
    %c0_i32_1 = arith.constant 0 : i32
    %c0_i32_2 = arith.constant 0 : i32
    return %c0_i32, %c0_i32_0, %c0_i32_1 : i32, i32, i32
  }
  func.func @transform_5(%arg0: i32, %arg1: i32) -> (i32, i32, i32) {
    %c0_i32 = arith.constant 0 : i32
    %c0_i32_0 = arith.constant 0 : i32
    return %arg0, %c0_i32, %arg1 : i32, i32, i32
  }
}

</mosaic_0001>

<bundles_post_ra>
// kernel: tpu_custom_call.1
= control target key start
LH: loop header
LB: loop body
LE: loop exit
PB: predicated region body
PF: predicated region fallthrough
CT: control target
= control target key end

     0   :  { %10 = vsyncpa [#allocation3], 0  ;;  %s1116_s0 = inlined_call_operand.vmem [shape: f32[2,8,256], index: 0, kind: input, shape index: {}]   ;;  %s1117_s1 = inlined_call_operand.vmem [shape: f32[2,2,8,1], index: 1, kind: input, shape index: {}]   ;;  %s1118_s2 = inlined_call_operand.vmem [shape: f32[2,2,8,1], index: 2, kind: input, shape index: {}]   ;;  %s1119_s3 = inlined_call_operand.vmem [shape: f32[3,16,8], index: 3, kind: input, shape index: {}]   ;;  %s1120_s4 = inlined_call_operand.vmem [shape: f32[3,16,1], index: 4, kind: input, shape index: {}]   ;;  %s1121_s5 = inlined_call_operand.hbm [shape: f32[2,16,256], index: 5, kind: output, shape index: {}]  }
   0x1   :  { %12 = vsyncpa [#allocation3 + $0x1], 0  ;;  %s942_s18 = smov 0   ;;  %s944_s19 = smov 0  }
   0x2   :  { %s946_s20 = smov 0   ;;  %s948_s21 = smov 0  }
   0x3   :  { %s950_s22 = smov 0   ;;  %s952_s23 = smov 0  }
   0x4   :  { %s954_s24 = smov 0   ;;  %s956_s25 = smov 0  }
   0x5 LB: > { %1125 = sst [smem:[#allocation5_spill]] %s900_s24  ;;  %s686_s26 = sadd.s32 4294967295, %s904_s25   ;;  %s904_s25 = sphi %s956_s25, %s18_s25   ;;  %s900_s24 = sphi %s954_s24, %s1132_s24   ;;  %s896_s23 = sphi %s952_s23, %s1137_s23   ;;  %s892_s22 = sphi %s950_s22, %s1130_s22   ;;  %s888_s21 = sphi %s948_s21, %s1136_s21   ;;  %s884_s20 = sphi %s946_s20, %s1135_s20   ;;  %s880_s19 = sphi %s944_s19, %s1134_s19   ;;  %s876_s18 = sphi %s942_s18, %s1133_s18  }
   0x6   : > { %s687_s27 = sadd.s32 4294967294, %s904_s25   ;;  %s27_s28 = sadd.s32 1, %s896_s23 }
   0x7   : > { %p28_p0 = scmp.ge.s32.totalorder %s27_s28, 2  ;;  %s30_s29 = sadd.s32 1, %s900_s24 }
   0x8   : > { %p175_p1 = scmp.ne.s32.totalorder %s884_s20, %s880_s19  ;;  %p176_p2 = scmp.eq.s32.totalorder %s686_s26, 3 }
   0x9   : > { %s1139_s28 = smov (%p28_p0, %s27_s28), 0  ;;  %s1141_s29 = smov (!%p28_p0, %s30_s29), %s900_s24 }
   0xa   : > { %1126 = sst [smem:[#allocation6_spill]] %s1139_s28  ;;  %s161_s30 = ssub.s32 %s896_s23, %s1139_s28 }
   0xb   : > { %p993_p3 = por %p176_p2, %p175_p1  ;;  %p32_p4 = scmp.ge.s32.totalorder %s1141_s29, 2 }
   0xc   : > { %p181_p5 = scmp.ne.s32.totalorder %s880_s19, %s876_s18  ;;  %p182_p6 = scmp.eq.s32.totalorder %s687_s27, 3 }
   0xd   : > { %p690_p7 = scmp.ge.s32.totalorder %s904_s25, 1  ;;  %s1143_s29 = smov (%p32_p4, %s1141_s29), 0 }
   0xe   : > { %1128 = sst [smem:[#allocation7_spill]] %s1143_s29  ;;  %p1002_p8 = por %p182_p6, %p181_p5 }
   0xf   : > { %p239_p9 = scmp.lt.s32.totalorder %s904_s25, 5  ;;  %s160_s8 = ssub.s32 %s900_s24, %s1143_s29 }
  0x10   : > { %s165_s9 = sadd.s32 1, %s884_s20  ;;  %s162_s10 = sor.u32 %s161_s30, %s160_s8 }
  0x11   : > { %p240_p10 = pnand %p690_p7, %p239_p9  ;;  %p163_p11 = scmp.eq.s32.totalorder %s162_s10, 0 }
  0x12   : > { %p286_p12 = scmp.lt.s32.totalorder (!%p240_p10), %s892_s22, 1  ;;  %p288_p13 = scmp.lt.s32.totalorder (!%p240_p10), %s888_s21, 1 }
  0x13   : > { %s1011_s11 = scalar_select %p163_p11, %s884_s20, %s165_s9  }
  0x14   : > { %243 = sbr.rel (%p240_p10) target bundleno = 384 (0x180), region = 40  ;;  %s907_s30 = smov (!%p240_p10), 1  }
  0x15   : > { %s908_s8 = smov (!%p240_p10), 127  }
  0x19   : > { %v906_v0 = vmov 0   ;;  %s287_s12 = scalar_select %p286_p12, %s892_s22, 1  ;;  %v708_v4 = vld [vmem:[%s1120_s4 + $0x10] sm:$0xff]  ;;  %v710_v5 = vld [vmem:[%s1120_s4 + $0x20] sm:$0xff]  ;;  %v711_v6 = vld [vmem:[%s1120_s4 + $0x28] sm:$0xff]  ;;  %vm338_vm0 = vcmask 64512   ;;  %v311_v10 = vlaneseq }
  0x1a   : > { %798 = vset.pattern.permute.xlu1 %v906_v0  ;;  %797 = vset.pattern.permute.xlu0 %v906_v0  ;;  %s289_s13 = scalar_select %p288_p13, %s888_s21, 1  ;;  %v698_v7 = vld [vmem:[%s1119_s3 + $0x10] sm:$0xff]  ;;  %v699_v8 = vld [vmem:[%s1119_s3 + $0x18] sm:$0xff]  ;;  %v431_v9 = vld [vmem:[%s1120_s4] sm:$0xff] }
  0x1b   : > { %799 = vset.pattern.permute.xlu2 %v906_v0  ;;  %s692_s14 = sshll.u32 %s287_s12, 1  ;;  %v432_v11 = vld [vmem:[%s1120_s4 + $0x8] sm:$0xff]  ;;  %v312_v14 = vand.u32 127, %v311_v10  ;;  %v709_v15 = vld [vmem:[%s1120_s4 + $0x18] sm:$0xff]  ;;  %v336_v18 = vld [vmem:[%s1119_s3] sm:$0xff] }
  0x1c   : > { %s291_s15 = sadd.s32 %s692_s14, %s289_s13  ;;  %435 = vperm.xlu2 %799, %v431_v9   ;;  %v704_v21 = vld [vmem:[%s1119_s3 + $0x20] sm:$0xff]  ;;  %v337_v22 = vld [vmem:[%s1119_s3 + $0x8] sm:$0xff] }
  0x1d   : > { %s693_s16 = sshll.u32 %s291_s15, 3  ;;  %vm313_vm1 = vcmp.eq.s32.totalorder %v312_v14, 0  ;;  %vm323_vm2 = vcmp.eq.s32.totalorder %v312_v14, 127  ;;  %v705_v23 = vld [vmem:[%s1119_s3 + $0x28] sm:$0xff] }
  0x1e   : > { %s293_s27 = scalar_lea.vmem %s1116_s0, %s693_s16  ;;  %s301_s29 = scalar_lea.vmem %s1117_s1, %s693_s16 }
  0x1f   : > { %v310_v1 = vld [vmem:[%s293_s27] sm:$0xff]  ;;  %s309_s12 = scalar_lea.vmem %s1118_s2, %s693_s16  ;;  %s715_s16 = sshll.u32 %s892_s22, 2 }
  0x20   : > { %315 = vrot.lane.b32.xlu1 %v310_v1, %s907_s30  ;;  %325 = vrot.lane.b32.xlu0 %v310_v1, %s908_s8  ;;  %v314_v2 = vld [vmem:[%s301_s29] sm:$0xff]  ;;  %s283_s30 = sand.u32 1, %s880_s19   ;;  %s563_s8 = sadd.s32 %s888_s21, %s715_s16 }
  0x21   : > { %389 = vmatpush.msra.mxu1 %v310_v1  ;;  %v324_v3 = vld [vmem:[%s309_s12] sm:$0xff]  ;;  %s691_s9 = sshll.u32 %s283_s30, 4  ;;  %s716_s10 = sshll.u32 %s563_s8, 3 }
  0x22   : > { %702 = vmatmul.msk.f32.vlgmr.msra.gmra.mxu1 %vm338_vm0, %v698_v7  ;;  %s565_s22 = scalar_lea.hbm %s1121_s5, %s716_s10  ;;  %s285_s21 = scalar_lea.vmem [#allocation2], %s691_s9 }
  0x23   : > { %s566_s14 = sshll.u32 %s285_s21, 4  ;;  %s568_s15 = sshll.u32 %s565_s22, 4  ;;  %s567_s14 = int_to_ptr.vmem [resolvable:$true] %s566_s14  ;;  %s569_s15 = int_to_ptr.hbm [resolvable:$true] %s568_s15 }
  0x24   : > { %440 = vperm.xlu2 %799, %v432_v11   ;;  %s553_s17 = scalar_lea.sflag [#allocation3], %s283_s30  ;;  %s824_s26 = sshra.s32 %s569_s15, 4  ;;  %s825_s26 = int_to_ptr.hbm [resolvable:$true] %s824_s26 }
  0x25   : > { %s826_s27 = scalar_lea.hbm %s825_s26, 16  ;;  %s830_s29 = scalar_lea.hbm %s1121_s5, 64 }
  0x26   : > { %p827_p0 = scmp.ne.s32.totalorder %s825_s26, %s826_s27  ;;  %p831_p4 = scmp.lt.s32.totalorder %s825_s26, %s1121_s5 }
  0x27   : > { %p832_p5 = scmp.lt.s32.totalorder %s830_s29, %s826_s27 }
  0x28   : > { %319 = vperm.xlu1 %798, %v314_v2   ;;  %329 = vperm.xlu0 %797, %v324_v3   ;;  %p828_p1 = pnand %p827_p0, %p993_p3 }
  0x29   : > { %p833_p6 = por %p832_p5, %p831_p4 }
  0x2a   : > { %703 = vmatmul.msk.f32.gmra.mxu1 %vm338_vm0, %v699_v8  ;;  %p829_p2 = pneg %p828_p1 }
  0x2c   : > { %490 = vperm.xlu2 %799, %v709_v15   ;;  %p834_p7 = pnand %p833_p6, %p829_p2 }
  0x30   : > { %485 = vperm.xlu1 %798, %v708_v4   ;;  %500 = vperm.xlu0 %797, %v710_v5  }
  0x38   : > { %505 = vperm.xlu1 %798, %v711_v6  }
  0x76   : > { %v436_v26 = vpop.permute.xlu2 %435 }
  0x7e   : > { %v441_v36 = vpop.permute.xlu2 %440 }
  0x86   : > { %v491_v7 = vpop.permute.xlu2 %490 }
  0x92   : > { %v316_v12 = vpop.permute.xlu1 %315  ;;  %v326_v13 = vpop.permute.xlu0 %325 }
  0x9a   : > { %v320_v16 = vpop.permute.xlu1 %319  ;;  %v330_v17 = vpop.permute.xlu0 %329 }
  0x9b   : > { %v322_v19 = vsel %vm313_vm1, %v320_v16, %v316_v12  ;;  %v332_v20 = vsel %vm323_vm2, %v330_v17, %v326_v13 }
  0x9c   : > { %360 = vmatpush.msra.mxu0 %v322_v19  ;;  %719 = vmatpush.msra.mxu3 %v322_v19 }
  0x9d   : > { %421 = vmatpush.msra.mxu2 %v332_v20  ;;  %700 = vmatmul.msk.f32.vlgmr.msra.gmra.mxu0 %vm338_vm0, %v336_v18 }
  0x9e   : > { %706 = vmatmul.msk.f32.vlgmr.msra.gmra.mxu2 %vm338_vm0, %v704_v21  ;;  %701 = vmatmul.msk.f32.vlgmr.msra.gmra.mxu3 %vm338_vm0, %v337_v22 }
  0x9f   : > { %v391_v24 = vpop.f32.mrf.mxu1 }
  0xa2   : > { %v486_v62 = vpop.permute.xlu1 %485  ;;  %v501_v10 = vpop.permute.xlu0 %500 }
  0xa6   : > { %707 = vmatmul.msk.f32.gmra.mxu2 %vm338_vm0, %v705_v23 }
  0xa7   : > { %v394_v30 = vpop.f32.mrf.mxu1 }
  0xaa   : > { %v506_v11 = vpop.permute.xlu1 %505 }
 0x11a   : > { %v362_v25 = vpop.f32.mrf.mxu0 }
 0x11b   : > { %v392_v28 = vadd.f32 %v391_v24, %v362_v25 }
 0x121   : > { %v423_v27 = vpop.f32.mrf.mxu2  ;;  %v365_v29 = vpop.f32.mrf.mxu3 }
 0x122   : > { %v429_v31 = vadd.f32 %v423_v27, %v392_v28  ;;  %v395_v32 = vadd.f32 %v394_v30, %v365_v29 }
 0x124   : > { %v443_v34 = vadd.f32 %v436_v26, %v429_v31 }
 0x126   : > { %v453_v38 = vmul.f32 %v443_v34, %v443_v34 }
 0x129   : > { %v426_v33 = vpop.f32.mrf.mxu2 }
 0x12a   : > { %v430_v35 = vadd.f32 %v426_v33, %v395_v32 }
 0x12c   : > { %v444_v37 = vadd.f32 %v441_v36, %v430_v35 }
 0x12e   : > { %v445_v39 = vadd.f32 %v444_v37, %v443_v34  ;;  %v454_v40 = vmul.f32 %v444_v37, %v444_v37 }
 0x130   : > { %v446_v41 = vrot.slane %v445_v39, 4  ;;  %v455_v42 = vadd.f32 %v454_v40, %v453_v38 }
 0x132   : > { %v447_v43 = vadd.f32 %v446_v41, %v445_v39  ;;  %v456_v44 = vrot.slane %v455_v42, 4 }
 0x134   : > { %v448_v45 = vrot.slane %v447_v43, 2  ;;  %v457_v46 = vadd.f32 %v456_v44, %v455_v42 }
 0x136   : > { %v449_v47 = vadd.f32 %v448_v45, %v447_v43  ;;  %v458_v48 = vrot.slane %v457_v46, 2 }
 0x138   : > { %v450_v49 = vrot.slane %v449_v47, 1  ;;  %v459_v50 = vadd.f32 %v458_v48, %v457_v46 }
 0x13a   : > { %v451_v51 = vadd.f32 %v450_v49, %v449_v47  ;;  %v460_v52 = vrot.slane %v459_v50, 1 }
 0x13c   : > { %v452_v53 = vmul.f32 0.0625, %v451_v51  ;;  %v461_v54 = vadd.f32 %v460_v52, %v459_v50 }
 0x13e   : > { %v462_v55 = vmul.f32 0.0625, %v461_v54  ;;  %v463_v56 = vmul.f32 %v452_v53, %v452_v53  ;;  %v465_v2 = vsub.f32 %v443_v34, %v452_v53  ;;  %v466_v3 = vsub.f32 %v444_v37, %v452_v53 }
 0x140   : > { %v464_v57 = vsub.f32 %v462_v55, %v463_v56 }
 0x142   : > { %v467_v58 = vadd.f32 1e-05, %v464_v57 }
 0x144   : > { %800 = vrsqrt.f32 %v467_v58  ;;  %vm474_vm4 = vweird.f32 %v467_v58 }
 0x14a   : > { %v801_v59 = vpop.eup %800 }
 0x14b   : > { %v469_v60 = vmul.f32 %v801_v59, %v467_v58  ;;  %vm475_vm3 = vweird.f32 %v801_v59 }
 0x14c   : > { %vm476_vm5 = vmor %vm474_vm4, %vm475_vm3 }
 0x14d   : > { %v470_v61 = vmul.f32 %v801_v59, %v469_v60 }
 0x14f   : > { %v471_v63 = vmul.f32 0.5, %v470_v61 }
 0x151   : > { %v472_v0 = vsub.f32 1.5, %v471_v63 }
 0x153   : > { %v473_v1 = vmul.f32 %v801_v59, %v472_v0 }
 0x155   : > { %v477_v4 = vsel %vm476_vm5, %v801_v59, %v473_v1 }
 0x156   : > { %v478_v5 = vmul.f32 %v477_v4, %v465_v2  ;;  %v479_v6 = vmul.f32 %v477_v4, %v466_v3 }
 0x158   : > { %v493_v8 = vmul.f32 %v486_v62, %v478_v5  ;;  %v494_v9 = vmul.f32 %v491_v7, %v479_v6 }
 0x15a   : > { %v508_v12 = vadd.f32 %v501_v10, %v493_v8  ;;  %v509_v13 = vadd.f32 %v506_v11, %v494_v9 }
 0x15c   : > { %v712_v14 = vmul.f32 -1.442695, %v508_v12  ;;  %v713_v15 = vmul.f32 -1.442695, %v509_v13 }
 0x15e   : > { %802 = vpow2.f32 %v712_v14 }
 0x15f   : > { %804 = vpow2.f32 %v713_v15 }
 0x164   : > { %v803_v16 = vpop.eup %802 }
 0x165   : > { %v805_v17 = vpop.eup %804  ;;  %v516_v18 = vadd.f32 1.0, %v803_v16 }
 0x166   : > { %v517_v19 = vadd.f32 1.0, %v805_v17 }
 0x167   : > { %806 = vrcp.f32 %v516_v18  ;;  %v529_v25 = vand.u32 2147483648, %v516_v18  ;;  %v527_v28 = vand.u32 2147483647, %v516_v18  ;;  %vm523_vm8 = vweird.f32 %v516_v18 }
 0x168   : > { %808 = vrcp.f32 %v517_v19  ;;  %v544_v29 = vand.u32 2147483648, %v517_v19  ;;  %v542_v31 = vand.u32 2147483647, %v517_v19  ;;  %vm538_vm10 = vweird.f32 %v517_v19 }
 0x169   : > { %v530_v33 = vor.u32 1.1754944e-38, %v529_v25  ;;  %vm528_vm11 = vcmp.eq.f32.partialorder %v527_v28, 8.507059e+37 }
 0x16a   : > { %v545_v36 = vor.u32 1.1754944e-38, %v544_v29  ;;  %vm543_vm13 = vcmp.eq.f32.partialorder %v542_v31, 8.507059e+37 }
 0x16d   : > { %v807_v20 = vpop.eup %806 }
 0x16e   : > { %v809_v21 = vpop.eup %808  ;;  %v519_v22 = vmul.f32 %v807_v20, %v516_v18  ;;  %vm524_vm6 = vweird.f32 %v807_v20 }
 0x16f   : > { %v534_v23 = vmul.f32 %v809_v21, %v517_v19  ;;  %vm539_vm7 = vweird.f32 %v809_v21  ;;  %vm525_vm9 = vmor %vm523_vm8, %vm524_vm6 }
 0x170   : > { %v520_v24 = vsub.f32 1.0, %v519_v22  ;;  %vm540_vm12 = vmor %vm538_vm10, %vm539_vm7 }
 0x171   : > { %v535_v26 = vsub.f32 1.0, %v534_v23 }
 0x172   : > { %v521_v27 = vmul.f32 %v807_v20, %v520_v24 }
 0x173   : > { %v536_v30 = vmul.f32 %v809_v21, %v535_v26 }
 0x174   : > { %v522_v32 = vadd.f32 %v807_v20, %v521_v27 }
 0x175   : > { %v537_v34 = vadd.f32 %v809_v21, %v536_v30 }
 0x176   : > { %v526_v35 = vsel %vm525_vm9, %v807_v20, %v522_v32 }
 0x177   : > { %v531_v37 = vsel %vm528_vm11, %v530_v33, %v526_v35  ;;  %v541_v38 = vsel %vm540_vm12, %v809_v21, %v537_v34 }
 0x178   : > { %v546_v39 = vsel %vm543_vm13, %v545_v36, %v541_v38  ;;  %v548_v40 = vmul.f32 %v531_v37, %v508_v12 }
 0x179   : > { %v549_v41 = vmul.f32 %v546_v39, %v509_v13 }
 0x17a   : > { %550 = vst [vmem:[%s285_s21] sm:$0xff] %v548_v40 }
 0x17b   : > { %551 = vst [vmem:[%s285_s21 + $0x8] sm:$0xff] %v549_v41 }
 0x17c   : > { %837 = shalt.err (!%p834_p7)
}
 0x17d   : > { %s909_s30 = smov 128   ;;  %s910_s9 = smov 256  }
 0x17e   : > { %s911_s10 = smov 8  }
 0x17f   : > { %720 = dma.vmem_to_hbm [thread:$0]  (%p993_p3), %s567_s14, 256, %s569_s15, %s553_s17, %s909_s30, %s910_s9, %s911_s10  }
 0x180 PF: > { %p726_p9 = scmp.ge.s32.totalorder %s904_s25, 2  ;;  %s583_s12 = sand.u32 1, %s876_s18  }
 0x181   : > { %s584_s13 = scalar_lea.sflag [#allocation3], %s583_s12 }
 0x182   : > { %p723_p10 = pnand %p726_p9, %p1002_p8 }
 0x184   : > { %p724_p11 = pneg %p723_p10 }
 0x186   : > { %871 = dma.done.wait (%p724_p11), %s584_s13, 256  }
 0x187   : > { %873 = vsyncadd (%p724_p11), %s584_s13, 4294967040  ;;  %s18_s25 = sadd.s32 1, %s904_s25   ;;  %s1130_s22 = sld [smem:[#allocation5_spill]] }
 0x188   : > { %p15_p12 = scmp.ge.s32.totalorder %s18_s25, 6   ;;  %s1131_s6 = sld [smem:[#allocation6_spill]] }
 0x189   : > { %s1132_s24 = sld [smem:[#allocation7_spill]]  ;;  %s1133_s18 = smov %s880_s19 }
 0x18a   : > { %s1134_s19 = smov %s884_s20  ;;  %s1135_s20 = smov %s1011_s11 }
 0x18b   : > { %s1136_s21 = smov %s896_s23  ;;  %17 = sbr.rel (!%p15_p12) target bundleno = 5 (0x5), region = 85 }
 0x18e   : > { %s1137_s23 = smov %s1131_s6 }
 0x190   :  { %590 = vsyncpa [#allocation3], 1 }
 0x191   :  { %592 = vsyncpa [#allocation3 + $0x1], 1 }

</bundles_post_ra>
